<compile_context>
chip_gen: v6e
topology: v6e:2x2x1
jax: 0.10.0
libtpu: 0.0.40
codegen_flags: <defaults>
</compile_context>

<pallas_src>
import jax
import jax.numpy as jnp
from jax.experimental import pallas as pl
from jax.experimental.pallas import tpu as pltpu

_LANE = 128
_SUBLANE = 8          # f32 sublane
_HIDDEN = 20
_TB_MAX_DICT = 512    # batch-tile cap for the image/dict path (d can be large)
_TB_MAX_VEC = 2048    # vec path: d is tiny, larger tiles amortize per-step overhead


def _round_up(x, m):
    return (x + m - 1) // m * m


def _cdiv(a, b):
    return -(-a // b)


def _batch_tiling(b, tb_max):
    """Pick (b_pad, tb).

    Goals: (a) avoid a wrapper pad copy when an exact multiple-of-8 tiling exists,
    (b) >= 2 grid steps when b >= 16 so both v7x TensorCores get work,
    (c) few, large steps (per-step overhead ~0.35 us), (d) never over-pad by more
    than nsteps*8 rows.
    """
    b8 = _round_up(b, _SUBLANE)
    min_steps = 2 if b8 >= 2 * _SUBLANE else 1
    # Exact divisors of b8 (multiples of 8) -> no padded rows beyond sublane round-up.
    exact = [tb for tb in range(_SUBLANE, min(tb_max, b8) + 1, _SUBLANE)
             if b8 % tb == 0 and b8 // tb >= min_steps]
    if exact:
        tb = max(exact)
        if b8 // tb <= 8:           # step-count still negligible
            return b8, tb
    # Otherwise pad by at most nsteps*8 rows to get large, even tiles.
    nsteps = max(min_steps, _cdiv(b8, tb_max))
    tb = _round_up(_cdiv(b8, nsteps), _SUBLANE)
    return tb * nsteps, tb


def _resident(shape):
    # Constant-index block: stays in VMEM across all grid steps. Single-buffered —
    # double-buffering a never-changing block only wastes VMEM (v7x: 64 MiB physical).
    return pl.BlockSpec(shape, lambda i: (0, 0), pipeline_mode=pl.Buffered(1))


def _vmem_limit_bytes(streamed, resident, out_block):
    """Explicit scoped-VMEM request: streamed blocks double-buffered, resident blocks
    single-buffered, output double-buffered, plus headroom for Mosaic scratch."""
    def nbytes(shape, dtype):
        n = 1
        for s in shape:
            n *= int(s)
        return n * jnp.dtype(dtype).itemsize
    total = sum(2 * nbytes(s, d) for s, d in streamed)
    total += sum(nbytes(s, d) for s, d in resident)
    total += 2 * nbytes(*out_block)
    return int(total) + (8 << 20)


# ----------------------------------------------------------------------------
# Kernels
# ----------------------------------------------------------------------------
def _qnet_vec_kernel(x_ref, w1_ref, b1_ref, w2_ref, b2_ref, w3_ref, b3_ref,
                     out_ref):
    """Linear(obs,20)->ReLU->Linear(20,20)->ReLU->Linear(20,n_act).

    Hidden dims lane-padded to 128 (zero rows/cols -> identical math); the output
    stays at n_act lanes (narrow masked store, no 128-lane padding).
    """
    wdt = w1_ref.dtype
    x = x_ref[...]
    h1 = jnp.maximum(
        jnp.dot(x, w1_ref[...], preferred_element_type=jnp.float32) + b1_ref[...],
        0.0)
    h2 = jnp.maximum(
        jnp.dot(h1.astype(wdt), w2_ref[...], preferred_element_type=jnp.float32)
        + b2_ref[...], 0.0)
    y = (jnp.dot(h2.astype(wdt), w3_ref[...], preferred_element_type=jnp.float32)
         + b3_ref[...])
    out_ref[...] = y.astype(out_ref.dtype)


def _qnet_dict_kernel(x_ref, phase_ref, w1_ref, b1_ref, w2o_ref, w2p_ref,
                      b2_ref, w3_ref, b3_ref, out_ref):
    """Flatten->Linear(D,20)->ReLU, cat(phase), Linear(24,20)->ReLU, Linear(20,A).

    Concat folded into a split matmul (no cross-lane movement):
        cat([h1, phase], 1) @ W2 = h1 @ W2[:20, :] + phase @ W2[20:, :]
    """
    wdt = w1_ref.dtype
    x = x_ref[...]
    phase = phase_ref[...]
    h1 = jnp.maximum(
        jnp.dot(x, w1_ref[...], preferred_element_type=jnp.float32) + b1_ref[...],
        0.0)
    h2 = jnp.maximum(
        jnp.dot(h1.astype(wdt), w2o_ref[...], preferred_element_type=jnp.float32)
        + jnp.dot(phase, w2p_ref[...], preferred_element_type=jnp.float32)
        + b2_ref[...], 0.0)
    y = (jnp.dot(h2.astype(wdt), w3_ref[...], preferred_element_type=jnp.float32)
         + b3_ref[...])
    out_ref[...] = y.astype(out_ref.dtype)


# ----------------------------------------------------------------------------
# Parameter init (deterministic; mimics torch.nn.Linear uniform(-1/sqrt(fan_in)))
# ----------------------------------------------------------------------------
def _linear_params(key, fan_in, fan_out):
    kw, kb = jax.random.split(key)
    bound = 1.0 / jnp.sqrt(jnp.float32(fan_in))
    # stored as (in, out) so the kernel does x @ W (== x @ torch_W.T)
    w = jax.random.uniform(kw, (fan_in, fan_out), jnp.float32, -bound, bound)
    b = jax.random.uniform(kb, (1, fan_out), jnp.float32, -bound, bound)
    return w, b


def _pad_to(a, shape):
    return jnp.pad(a, [(0, s - d) for d, s in zip(a.shape, shape)])


def init_qnetwork_vec_params(key, obs_dim, n_act, hidden=_HIDDEN,
                             stream_dtype=jnp.float32):
    k1, k2, k3 = jax.random.split(key, 3)
    w1, b1 = _linear_params(k1, obs_dim, hidden)
    w2, b2 = _linear_params(k2, hidden, hidden)
    w3, b3 = _linear_params(k3, hidden, n_act)
    ref = dict(w1=w1, b1=b1, w2=w2, b2=b2, w3=w3, b3=b3)

    hp = _round_up(hidden, _LANE)
    kparams = dict(
        w1=_pad_to(w1, (obs_dim, hp)).astype(stream_dtype),
        b1=_pad_to(b1, (1, hp)),                               # biases stay f32
        w2=_pad_to(w2, (hp, hp)).astype(stream_dtype),
        b2=_pad_to(b2, (1, hp)),
        w3=_pad_to(w3, (hp, n_act)).astype(stream_dtype),      # out dim stays narrow
        b3=b3)
    return kparams, ref


def init_qnetwork_dict_params(key, obs_shape_hwc, n_act, hidden=_HIDDEN,
                              stream_dtype=jnp.float32):
    h, w, c = obs_shape_hwc
    flat = h * w * c
    k1, k2, k3 = jax.random.split(key, 3)
    # torch-equivalent layout: Linear fan-in indexed in (C,H,W) flatten order
    w1_chw, b1 = _linear_params(k1, flat, hidden)
    w2, b2 = _linear_params(k2, hidden + n_act, hidden)
    w3, b3 = _linear_params(k3, hidden, n_act)
    ref = dict(w1_chw=w1_chw, b1=b1, w2=w2, b2=b2, w3=w3, b3=b3)

    # Fold PyTorch permute(0,3,1,2)+Flatten into W1: reorder rows from (c,h,w) flat
    # order to (h,w,c) flat order so the wrapper only reshapes (no HBM transpose).
    w1_hwc = jnp.transpose(w1_chw.reshape(c, h, w, hidden),
                           (1, 2, 0, 3)).reshape(flat, hidden)

    hp = _round_up(hidden, _LANE)
    kparams = dict(
        w1=_pad_to(w1_hwc, (flat, hp)).astype(stream_dtype),
        b1=_pad_to(b1, (1, hp)),
        w2_obs=_pad_to(w2[:hidden, :], (hp, hp)).astype(stream_dtype),
        w2_phase=_pad_to(w2[hidden:, :], (n_act, hp)).astype(stream_dtype),
        b2=_pad_to(b2, (1, hp)),
        w3=_pad_to(w3, (hp, n_act)).astype(stream_dtype),
        b3=b3)
    return kparams, ref


# ----------------------------------------------------------------------------
# Wrappers
# ----------------------------------------------------------------------------
@jax.jit
def qnetwork_vec_forward(obs, params):
    """obs: (B, obs_dim) float32 -> (B, n_act) float32."""
    b, d = obs.shape
    hp = params["w1"].shape[1]
    n_act = params["w3"].shape[1]
    sdt = params["w1"].dtype
    it = jnp.dtype(sdt).itemsize

    b_pad, tb = _batch_tiling(b, _TB_MAX_VEC)
    x = obs.astype(sdt)
    if b_pad != b:
        x = jnp.pad(x, ((0, b_pad - b), (0, 0)))

    cost = pl.CostEstimate(
        flops=2 * b_pad * (d * hp + hp * hp + hp * n_act),
        transcendentals=0,
        bytes_accessed=(it * (b_pad * d + d * hp + hp * hp + hp * n_act)
                        + 4 * (b_pad * n_act + 2 * hp + n_act)))

    vmem = _vmem_limit_bytes(
        streamed=[((tb, d), sdt)],
        resident=[((d, hp), sdt), ((1, hp), jnp.float32),
                  ((hp, hp), sdt), ((1, hp), jnp.float32),
                  ((hp, n_act), sdt), ((1, n_act), jnp.float32)],
        out_block=((tb, n_act), jnp.float32))

    out = pl.pallas_call(
        _qnet_vec_kernel,
        out_shape=jax.ShapeDtypeStruct((b_pad, n_act), jnp.float32),
        grid=(b_pad // tb,),
        in_specs=[
            pl.BlockSpec((tb, d), lambda i: (i, 0)),   # activations: streamed
            _resident((d, hp)), _resident((1, hp)),    # w1, b1 (VMEM-resident)
            _resident((hp, hp)), _resident((1, hp)),   # w2, b2
            _resident((hp, n_act)), _resident((1, n_act)),   # w3, b3 (narrow)
        ],
        out_specs=pl.BlockSpec((tb, n_act), lambda i: (i, 0)),
        compiler_params=pltpu.CompilerParams(
            dimension_semantics=("parallel",), vmem_limit_bytes=vmem),
        cost_estimate=cost,
    )(x, params["w1"], params["b1"], params["w2"], params["b2"],
      params["w3"], params["b3"])
    # Padded batch rows (>= b) carry bias+ReLU garbage — drop them here.
    return out if b_pad == b else out[:b]


@jax.jit
def qnetwork_dict_forward(obs_img, phase, params):
    """obs_img: (B, H, W, C) float32 (NHWC); phase: (B, n_act) -> (B, n_act) f32."""
    b = obs_img.shape[0]
    d = obs_img.shape[1] * obs_img.shape[2] * obs_img.shape[3]
    na = phase.shape[1]
    hp = params["w1"].shape[1]
    n_act = params["w3"].shape[1]
    sdt = params["w1"].dtype
    it = jnp.dtype(sdt).itemsize

    # Permutation is folded into W1 at init: a plain reshape (no HBM transpose).
    x = obs_img.reshape(b, d).astype(sdt)
    ph = phase.astype(sdt)

    b_pad, tb = _batch_tiling(b, _TB_MAX_DICT)
    if b_pad != b:
        x = jnp.pad(x, ((0, b_pad - b), (0, 0)))
        ph = jnp.pad(ph, ((0, b_pad - b), (0, 0)))

    cost = pl.CostEstimate(
        flops=2 * b_pad * (d * hp + hp * hp + na * hp + hp * n_act),
        transcendentals=0,
        bytes_accessed=(it * (b_pad * (d + na)
                              + d * hp + hp * hp + na * hp + hp * n_act)
                        + 4 * (b_pad * n_act + 2 * hp + n_act)))

    vmem = _vmem_limit_bytes(
        streamed=[((tb, d), sdt), ((tb, na), sdt)],
        resident=[((d, hp), sdt), ((1, hp), jnp.float32),
                  ((hp, hp), sdt), ((na, hp), sdt), ((1, hp), jnp.float32),
                  ((hp, n_act), sdt), ((1, n_act), jnp.float32)],
        out_block=((tb, n_act), jnp.float32))

    out = pl.pallas_call(
        _qnet_dict_kernel,
        out_shape=jax.ShapeDtypeStruct((b_pad, n_act), jnp.float32),
        grid=(b_pad // tb,),
        in_specs=[
            pl.BlockSpec((tb, d), lambda i: (i, 0)),     # flattened obs: streamed
            pl.BlockSpec((tb, na), lambda i: (i, 0)),    # phase: streamed
            _resident((d, hp)), _resident((1, hp)),      # w1, b1
            _resident((hp, hp)), _resident((na, hp)),    # w2_obs, w2_phase
            _resident((1, hp)),                          # b2
            _resident((hp, n_act)), _resident((1, n_act)),   # w3, b3 (narrow)
        ],
        out_specs=pl.BlockSpec((tb, n_act), lambda i: (i, 0)),
        compiler_params=pltpu.CompilerParams(
            dimension_semantics=("parallel",), vmem_limit_bytes=vmem),
        cost_estimate=cost,
    )(x, ph, params["w1"], params["b1"], params["w2_obs"],
      params["w2_phase"], params["b2"], params["w3"], params["b3"])
    return out if b_pad == b else out[:b]


# ----------------------------------------------------------------------------
# Pure-JAX references (torch-equivalent math, unpadded f32 weights, explicit permute)
# ----------------------------------------------------------------------------
def _ref_vec(obs, p):
    h1 = jax.nn.relu(obs @ p["w1"] + p["b1"])
    h2 = jax.nn.relu(h1 @ p["w2"] + p["b2"])
    return h2 @ p["w3"] + p["b3"]


def _ref_dict(obs_img, phase, p):
    b = obs_img.shape[0]
    x = jnp.transpose(obs_img, (0, 3, 1, 2)).reshape(b, -1)  # PyTorch permute+Flatten
    h1 = jax.nn.relu(x @ p["w1_chw"] + p["b1"])
    x1 = jnp.concatenate([h1, phase], axis=1)
    h2 = jax.nn.relu(x1 @ p["w2"] + p["b2"])
    return h2 @ p["w3"] + p["b3"]


if __name__ == "__main__":
    key = jax.random.PRNGKey(0)
    k_obs, k_phase, k_vec, k_p1, k_p2 = jax.random.split(key, 5)

    B, H, W, C = 2, 16, 16, 4
    N_ACT = 4
    OBS_DIM = 8

    obs_img = jax.random.normal(k_obs, (B, H, W, C), jnp.float32)
    phase = jax.random.normal(k_phase, (B, N_ACT), jnp.float32)
    obs_vec = jax.random.normal(k_vec, (B, OBS_DIM), jnp.float32)

    # --- dict-observation branch (layers1 / layers2), f32 streaming ---------------
    dict_params, dict_ref_params = init_qnetwork_dict_params(k_p1, (H, W, C), N_ACT)
    out_dict = jax.block_until_ready(
        qnetwork_dict_forward(obs_img, phase, dict_params))
    ref_dict = _ref_dict(obs_img, phase, dict_ref_params)
    assert out_dict.shape == (B, N_ACT)
    assert jnp.allclose(out_dict, ref_dict, atol=1e-4, rtol=1e-4)

    # --- dict branch, bf16 streaming (f32 accumulation) ---------------------------
    dict_params_bf16, _ = init_qnetwork_dict_params(
        k_p1, (H, W, C), N_ACT, stream_dtype=jnp.bfloat16)
    out_dict_bf16 = jax.block_until_ready(
        qnetwork_dict_forward(obs_img, phase, dict_params_bf16))
    assert out_dict_bf16.shape == (B, N_ACT)
    assert float(jnp.max(jnp.abs(out_dict_bf16 - ref_dict))) < 5e-2

    # --- flat-observation branch (self.layers), f32 -------------------------------
    vec_params, vec_ref_params = init_qnetwork_vec_params(k_p2, OBS_DIM, N_ACT)
    out_vec = jax.block_until_ready(qnetwork_vec_forward(obs_vec, vec_params))
    ref_vec = _ref_vec(obs_vec, vec_ref_params)
    assert out_vec.shape == (B, N_ACT)
    assert jnp.allclose(out_vec, ref_vec, atol=1e-4, rtol=1e-4)

    # --- flat branch, bf16 streaming ----------------------------------------------
    vec_params_bf16, _ = init_qnetwork_vec_params(
        k_p2, OBS_DIM, N_ACT, stream_dtype=jnp.bfloat16)
    out_vec_bf16 = jax.block_until_ready(
        qnetwork_vec_forward(obs_vec, vec_params_bf16))
    assert float(jnp.max(jnp.abs(out_vec_bf16 - ref_vec))) < 5e-2

    print("KERNEL_OK")
</pallas_src>

<mosaic_0001>
module attributes {stable_mosaic.version = 11 : i64} {
  func.func @_qnet_dict_kernel(%arg0: i32, %arg1: memref<8x1024xf32, #tpu.memory_space<vmem>>, %arg2: memref<8x4xf32, #tpu.memory_space<vmem>>, %arg3: memref<1024x128xf32, #tpu.memory_space<vmem>>, %arg4: memref<1x128xf32, #tpu.memory_space<vmem>>, %arg5: memref<128x128xf32, #tpu.memory_space<vmem>>, %arg6: memref<4x128xf32, #tpu.memory_space<vmem>>, %arg7: memref<1x128xf32, #tpu.memory_space<vmem>>, %arg8: memref<128x4xf32, #tpu.memory_space<vmem>>, %arg9: memref<1x4xf32, #tpu.memory_space<vmem>>, %arg10: memref<8x4xf32, #tpu.memory_space<vmem>>) attributes {dimension_semantics = [#tpu.dimension_semantics<parallel>], iteration_bounds = array<i64: 1>, scalar_prefetch = 0 : i64, scratch_operands = 0 : i64, tpu.core_type = #tpu.core_type<tc>, window_params = [{transform_indices = @transform_0, window_bounds = array<i64: 8, 1024>}, {transform_indices = @transform_1, window_bounds = array<i64: 8, 4>}, {pipeline_mode = #tpu.pipeline_mode<synchronous>, transform_indices = @transform_2, window_bounds = array<i64: 1024, 128>}, {pipeline_mode = #tpu.pipeline_mode<synchronous>, transform_indices = @transform_3, window_bounds = array<i64: 1, 128>}, {pipeline_mode = #tpu.pipeline_mode<synchronous>, transform_indices = @transform_4, window_bounds = array<i64: 128, 128>}, {pipeline_mode = #tpu.pipeline_mode<synchronous>, transform_indices = @transform_5, window_bounds = array<i64: 4, 128>}, {pipeline_mode = #tpu.pipeline_mode<synchronous>, transform_indices = @transform_6, window_bounds = array<i64: 1, 128>}, {pipeline_mode = #tpu.pipeline_mode<synchronous>, transform_indices = @transform_7, window_bounds = array<i64: 128, 4>}, {pipeline_mode = #tpu.pipeline_mode<synchronous>, transform_indices = @transform_8, window_bounds = array<i64: 1, 4>}, {transform_indices = @transform_9, window_bounds = array<i64: 8, 4>}]} {
    %c0 = arith.constant 0 : index
    %c0_0 = arith.constant 0 : index
    %0 = vector.load %arg1[%c0, %c0_0] : memref<8x1024xf32, #tpu.memory_space<vmem>>, vector<8x1024xf32>
    %c0_1 = arith.constant 0 : index
    %c0_2 = arith.constant 0 : index
    %1 = vector.load %arg2[%c0_1, %c0_2] : memref<8x4xf32, #tpu.memory_space<vmem>>, vector<8x4xf32>
    %c0_3 = arith.constant 0 : index
    %c0_4 = arith.constant 0 : index
    %2 = vector.load %arg3[%c0_3, %c0_4] : memref<1024x128xf32, #tpu.memory_space<vmem>>, vector<1024x128xf32>
    %cst = arith.constant dense<0.000000e+00> : vector<8x128xf32>
    %3 = tpu.matmul %0, %2, %cst {dimension_numbers = #tpu.dot_dimension_numbers<[1], [0], [0], [1], [0, 0, 1, 1], [], []>} : vector<8x1024xf32>, vector<1024x128xf32>, vector<8x128xf32> -> vector<8x128xf32>
    %c0_5 = arith.constant 0 : index
    %c0_6 = arith.constant 0 : index
    %4 = vector.load %arg4[%c0_5, %c0_6] : memref<1x128xf32, #tpu.memory_space<vmem>>, vector<1x128xf32>
    %5 = vector.broadcast %4 : vector<1x128xf32> to vector<8x128xf32>
    %6 = arith.addf %3, %5 : vector<8x128xf32>
    %cst_7 = arith.constant 0.000000e+00 : f32
    %7 = vector.broadcast %cst_7 : f32 to vector<8x128xf32>
    %8 = arith.maximumf %6, %7 : vector<8x128xf32>
    %c0_8 = arith.constant 0 : index
    %c0_9 = arith.constant 0 : index
    %9 = vector.load %arg5[%c0_8, %c0_9] : memref<128x128xf32, #tpu.memory_space<vmem>>, vector<128x128xf32>
    %cst_10 = arith.constant dense<0.000000e+00> : vector<8x128xf32>
    %10 = tpu.matmul %8, %9, %cst_10 {dimension_numbers = #tpu.dot_dimension_numbers<[1], [0], [0], [1], [0, 0, 1, 1], [], []>} : vector<8x128xf32>, vector<128x128xf32>, vector<8x128xf32> -> vector<8x128xf32>
    %c0_11 = arith.constant 0 : index
    %c0_12 = arith.constant 0 : index
    %11 = vector.load %arg6[%c0_11, %c0_12] : memref<4x128xf32, #tpu.memory_space<vmem>>, vector<4x128xf32>
    %cst_13 = arith.constant dense<0.000000e+00> : vector<8x128xf32>
    %12 = tpu.matmul %1, %11, %cst_13 {dimension_numbers = #tpu.dot_dimension_numbers<[1], [0], [0], [1], [0, 0, 1, 1], [], []>} : vector<8x4xf32>, vector<4x128xf32>, vector<8x128xf32> -> vector<8x128xf32>
    %13 = arith.addf %10, %12 : vector<8x128xf32>
    %c0_14 = arith.constant 0 : index
    %c0_15 = arith.constant 0 : index
    %14 = vector.load %arg7[%c0_14, %c0_15] : memref<1x128xf32, #tpu.memory_space<vmem>>, vector<1x128xf32>
    %15 = vector.broadcast %14 : vector<1x128xf32> to vector<8x128xf32>
    %16 = arith.addf %13, %15 : vector<8x128xf32>
    %cst_16 = arith.constant 0.000000e+00 : f32
    %17 = vector.broadcast %cst_16 : f32 to vector<8x128xf32>
    %18 = arith.maximumf %16, %17 : vector<8x128xf32>
    %c0_17 = arith.constant 0 : index
    %c0_18 = arith.constant 0 : index
    %19 = vector.load %arg8[%c0_17, %c0_18] : memref<128x4xf32, #tpu.memory_space<vmem>>, vector<128x4xf32>
    %cst_19 = arith.constant dense<0.000000e+00> : vector<8x4xf32>
    %20 = tpu.matmul %18, %19, %cst_19 {dimension_numbers = #tpu.dot_dimension_numbers<[1], [0], [0], [1], [0, 0, 1, 1], [], []>} : vector<8x128xf32>, vector<128x4xf32>, vector<8x4xf32> -> vector<8x4xf32>
    %c0_20 = arith.constant 0 : index
    %c0_21 = arith.constant 0 : index
    %21 = vector.load %arg9[%c0_20, %c0_21] : memref<1x4xf32, #tpu.memory_space<vmem>>, vector<1x4xf32>
    %22 = vector.broadcast %21 : vector<1x4xf32> to vector<8x4xf32>
    %23 = arith.addf %20, %22 : vector<8x4xf32>
    %c0_22 = arith.constant 0 : index
    %c0_23 = arith.constant 0 : index
    %24 = vector.load %arg10[%c0_22, %c0_23] : memref<8x4xf32, #tpu.memory_space<vmem>>, vector<8x4xf32>
    tpu.vector_store %arg10[%c0_22, %c0_23], %23 {strides = array<i32>} : memref<8x4xf32, #tpu.memory_space<vmem>>, vector<8x4xf32>,
    return
  }
  func.func @transform_0(%arg0: i32) -> (i32, i32) {
    %c0_i32 = arith.constant 0 : i32
    %c0_i32_0 = arith.constant 0 : i32
    return %arg0, %c0_i32 : i32, i32
  }
  func.func @transform_1(%arg0: i32) -> (i32, i32) {
    %c0_i32 = arith.constant 0 : i32
    %c0_i32_0 = arith.constant 0 : i32
    return %arg0, %c0_i32 : i32, i32
  }
  func.func @transform_2(%arg0: i32) -> (i32, i32) {
    %c0_i32 = arith.constant 0 : i32
    %c0_i32_0 = arith.constant 0 : i32
    %c0_i32_1 = arith.constant 0 : i32
    return %c0_i32, %c0_i32_0 : i32, i32
  }
  func.func @transform_3(%arg0: i32) -> (i32, i32) {
    %c0_i32 = arith.constant 0 : i32
    %c0_i32_0 = arith.constant 0 : i32
    %c0_i32_1 = arith.constant 0 : i32
    return %c0_i32, %c0_i32_0 : i32, i32
  }
  func.func @transform_4(%arg0: i32) -> (i32, i32) {
    %c0_i32 = arith.constant 0 : i32
    %c0_i32_0 = arith.constant 0 : i32
    %c0_i32_1 = arith.constant 0 : i32
    return %c0_i32, %c0_i32_0 : i32, i32
  }
  func.func @transform_5(%arg0: i32) -> (i32, i32) {
    %c0_i32 = arith.constant 0 : i32
    %c0_i32_0 = arith.constant 0 : i32
    %c0_i32_1 = arith.constant 0 : i32
    return %c0_i32, %c0_i32_0 : i32, i32
  }
  func.func @transform_6(%arg0: i32) -> (i32, i32) {
    %c0_i32 = arith.constant 0 : i32
    %c0_i32_0 = arith.constant 0 : i32
    %c0_i32_1 = arith.constant 0 : i32
    return %c0_i32, %c0_i32_0 : i32, i32
  }
  func.func @transform_7(%arg0: i32) -> (i32, i32) {
    %c0_i32 = arith.constant 0 : i32
    %c0_i32_0 = arith.constant 0 : i32
    %c0_i32_1 = arith.constant 0 : i32
    return %c0_i32, %c0_i32_0 : i32, i32
  }
  func.func @transform_8(%arg0: i32) -> (i32, i32) {
    %c0_i32 = arith.constant 0 : i32
    %c0_i32_0 = arith.constant 0 : i32
    %c0_i32_1 = arith.constant 0 : i32
    return %c0_i32, %c0_i32_0 : i32, i32
  }
  func.func @transform_9(%arg0: i32) -> (i32, i32) {
    %c0_i32 = arith.constant 0 : i32
    %c0_i32_0 = arith.constant 0 : i32
    return %arg0, %c0_i32 : i32, i32
  }
}

</mosaic_0001>

<bundles_post_ra>
// kernel: qnetwork_dict_forward.1
= control target key start
LH: loop header
LB: loop body
LE: loop exit
PB: predicated region body
PF: predicated region fallthrough
CT: control target
= control target key end

     0   :  { %vm478_vm0 = vcmask 1043456   ;;  %vm988_vm1 = vmmov 0   ;;  %vm474_vm2 = vcmask 31744   ;;  %s1599_s2 = inlined_call_operand.vmem [shape: f32[1024,128], index: 2, kind: input, shape index: {}]   ;;  %s1600_s0 = inlined_call_operand.vmem [shape: f32[8,1024], index: 0, kind: input, shape index: {}]   ;;  %s1601_s4 = inlined_call_operand.vmem [shape: f32[128,128], index: 4, kind: input, shape index: {}]   ;;  %s1602_s5 = inlined_call_operand.vmem [shape: f32[4,128], index: 5, kind: input, shape index: {}]   ;;  %s1603_s1 = inlined_call_operand.vmem [shape: f32[8,4], index: 1, kind: input, shape index: {}]   ;;  %s1604_s7 = inlined_call_operand.vmem [shape: f32[128,4], index: 7, kind: input, shape index: {}]   ;;  %s1605_s3 = inlined_call_operand.vmem [shape: f32[1,128], index: 3, kind: input, shape index: {}]   ;;  %s1606_s6 = inlined_call_operand.vmem [shape: f32[1,128], index: 6, kind: input, shape index: {}]   ;;  %s1607_s8 = inlined_call_operand.vmem [shape: f32[1,4], index: 8, kind: input, shape index: {}]   ;;  %s1608_s9 = inlined_call_operand.vmem [shape: f32[8,4], index: 9, kind: output, shape index: {}]  }
   0x1   :  { %v72_v0 = vld [vmem:[%s1599_s2 + $0xf8] sm:$0xff]  ;;  %v71_v4 = vld [vmem:[%s1599_s2 + $0xf0] sm:$0xff]  ;;  %v70_v8 = vld [vmem:[%s1599_s2 + $0xe8] sm:$0xff] }
   0x2   :  { %v104_v1 = vld [vmem:[%s1599_s2 + $0x1f8] sm:$0xff]  ;;  %734 = vmatprep.subr.mxu0 %v72_v0  ;;  %v103_v5 = vld [vmem:[%s1599_s2 + $0x1f0] sm:$0xff]  ;;  %v102_v9 = vld [vmem:[%s1599_s2 + $0x1e8] sm:$0xff] }
   0x3   :  { %v56_v2 = vld [vmem:[%s1599_s2 + $0x78] sm:$0xff]  ;;  %769 = vmatprep.subr.mxu1 %v104_v1  ;;  %v55_v6 = vld [vmem:[%s1599_s2 + $0x70] sm:$0xff]  ;;  %v54_v10 = vld [vmem:[%s1599_s2 + $0x68] sm:$0xff] }
   0x4   :  { %v88_v3 = vld [vmem:[%s1599_s2 + $0x178] sm:$0xff]  ;;  %735 = vmatpush3.msra.mxu0 %v56_v2  ;;  %v87_v7 = vld [vmem:[%s1599_s2 + $0x170] sm:$0xff]  ;;  %v86_v11 = vld [vmem:[%s1599_s2 + $0x168] sm:$0xff] }
   0x5   :  { %770 = vmatpush3.msra.mxu1 %v88_v3  ;;  %736 = vmatprep.subr.mxu0 %v71_v4  ;;  %v69_v12 = vld [vmem:[%s1599_s2 + $0xe0] sm:$0xff]  ;;  %v68_v16 = vld [vmem:[%s1599_s2 + $0xd8] sm:$0xff]  ;;  %v67_v20 = vld [vmem:[%s1599_s2 + $0xd0] sm:$0xff] }
   0x6   :  { %771 = vmatprep.subr.mxu1 %v103_v5  ;;  %737 = vmatpush3.msra.mxu0 %v55_v6  ;;  %v101_v13 = vld [vmem:[%s1599_s2 + $0x1e0] sm:$0xff]  ;;  %v100_v17 = vld [vmem:[%s1599_s2 + $0x1d8] sm:$0xff]  ;;  %v99_v21 = vld [vmem:[%s1599_s2 + $0x1d0] sm:$0xff] }
   0x7   :  { %772 = vmatpush3.msra.mxu1 %v87_v7  ;;  %738 = vmatprep.subr.mxu0 %v70_v8  ;;  %v53_v14 = vld [vmem:[%s1599_s2 + $0x60] sm:$0xff]  ;;  %v52_v18 = vld [vmem:[%s1599_s2 + $0x58] sm:$0xff]  ;;  %v51_v22 = vld [vmem:[%s1599_s2 + $0x50] sm:$0xff] }
   0x8   :  { %773 = vmatprep.subr.mxu1 %v102_v9  ;;  %v85_v15 = vld [vmem:[%s1599_s2 + $0x160] sm:$0xff]  ;;  %739 = vmatpush3.msra.mxu0 %v54_v10  ;;  %v84_v19 = vld [vmem:[%s1599_s2 + $0x158] sm:$0xff]  ;;  %v83_v23 = vld [vmem:[%s1599_s2 + $0x150] sm:$0xff] }
   0x9   :  { %774 = vmatpush3.msra.mxu1 %v86_v11  ;;  %740 = vmatprep.subr.mxu0 %v69_v12  ;;  %v66_v24 = vld [vmem:[%s1599_s2 + $0xc8] sm:$0xff]  ;;  %v65_v28 = vld [vmem:[%s1599_s2 + $0xc0] sm:$0xff]  ;;  %v64_v32 = vld [vmem:[%s1599_s2 + $0xb8] sm:$0xff] }
   0xa   :  { %775 = vmatprep.subr.mxu1 %v101_v13  ;;  %741 = vmatpush3.msra.mxu0 %v53_v14  ;;  %v98_v25 = vld [vmem:[%s1599_s2 + $0x1c8] sm:$0xff]  ;;  %v97_v29 = vld [vmem:[%s1599_s2 + $0x1c0] sm:$0xff]  ;;  %v96_v33 = vld [vmem:[%s1599_s2 + $0x1b8] sm:$0xff] }
   0xb   :  { %776 = vmatpush3.msra.mxu1 %v85_v15  ;;  %742 = vmatprep.subr.mxu0 %v68_v16  ;;  %v50_v26 = vld [vmem:[%s1599_s2 + $0x48] sm:$0xff]  ;;  %v49_v30 = vld [vmem:[%s1599_s2 + $0x40] sm:$0xff]  ;;  %v48_v34 = vld [vmem:[%s1599_s2 + $0x38] sm:$0xff] }
   0xc   :  { %777 = vmatprep.subr.mxu1 %v100_v17  ;;  %743 = vmatpush3.msra.mxu0 %v52_v18  ;;  %v82_v27 = vld [vmem:[%s1599_s2 + $0x148] sm:$0xff]  ;;  %v81_v31 = vld [vmem:[%s1599_s2 + $0x140] sm:$0xff]  ;;  %v80_v35 = vld [vmem:[%s1599_s2 + $0x138] sm:$0xff] }
   0xd   :  { %778 = vmatpush3.msra.mxu1 %v84_v19  ;;  %744 = vmatprep.subr.mxu0 %v67_v20  ;;  %v63_v36 = vld [vmem:[%s1599_s2 + $0xb0] sm:$0xff]  ;;  %v62_v40 = vld [vmem:[%s1599_s2 + $0xa8] sm:$0xff]  ;;  %v61_v44 = vld [vmem:[%s1599_s2 + $0xa0] sm:$0xff] }
   0xe   :  { %779 = vmatprep.subr.mxu1 %v99_v21  ;;  %745 = vmatpush3.msra.mxu0 %v51_v22  ;;  %v95_v37 = vld [vmem:[%s1599_s2 + $0x1b0] sm:$0xff]  ;;  %v94_v41 = vld [vmem:[%s1599_s2 + $0x1a8] sm:$0xff]  ;;  %v93_v45 = vld [vmem:[%s1599_s2 + $0x1a0] sm:$0xff] }
   0xf   :  { %780 = vmatpush3.msra.mxu1 %v83_v23  ;;  %746 = vmatprep.subr.mxu0 %v66_v24  ;;  %v47_v38 = vld [vmem:[%s1599_s2 + $0x30] sm:$0xff]  ;;  %v46_v42 = vld [vmem:[%s1599_s2 + $0x28] sm:$0xff]  ;;  %v45_v46 = vld [vmem:[%s1599_s2 + $0x20] sm:$0xff] }
  0x10   :  { %781 = vmatprep.subr.mxu1 %v98_v25  ;;  %747 = vmatpush3.msra.mxu0 %v50_v26  ;;  %v79_v39 = vld [vmem:[%s1599_s2 + $0x130] sm:$0xff]  ;;  %v78_v43 = vld [vmem:[%s1599_s2 + $0x128] sm:$0xff]  ;;  %v77_v47 = vld [vmem:[%s1599_s2 + $0x120] sm:$0xff] }
  0x11   :  { %782 = vmatpush3.msra.mxu1 %v82_v27  ;;  %748 = vmatprep.subr.mxu0 %v65_v28  ;;  %v60_v48 = vld [vmem:[%s1599_s2 + $0x98] sm:$0xff]  ;;  %v59_v52 = vld [vmem:[%s1599_s2 + $0x90] sm:$0xff]  ;;  %v58_v56 = vld [vmem:[%s1599_s2 + $0x88] sm:$0xff] }
  0x12   :  { %783 = vmatprep.subr.mxu1 %v97_v29  ;;  %749 = vmatpush3.msra.mxu0 %v49_v30  ;;  %v92_v49 = vld [vmem:[%s1599_s2 + $0x198] sm:$0xff]  ;;  %v91_v53 = vld [vmem:[%s1599_s2 + $0x190] sm:$0xff]  ;;  %v90_v57 = vld [vmem:[%s1599_s2 + $0x188] sm:$0xff] }
  0x13   :  { %784 = vmatpush3.msra.mxu1 %v81_v31  ;;  %750 = vmatprep.subr.mxu0 %v64_v32  ;;  %v44_v50 = vld [vmem:[%s1599_s2 + $0x18] sm:$0xff]  ;;  %v43_v54 = vld [vmem:[%s1599_s2 + $0x10] sm:$0xff]  ;;  %v42_v58 = vld [vmem:[%s1599_s2 + $0x8] sm:$0xff] }
  0x14   :  { %785 = vmatprep.subr.mxu1 %v96_v33  ;;  %751 = vmatpush3.msra.mxu0 %v48_v34  ;;  %v76_v51 = vld [vmem:[%s1599_s2 + $0x118] sm:$0xff]  ;;  %v75_v55 = vld [vmem:[%s1599_s2 + $0x110] sm:$0xff]  ;;  %v74_v59 = vld [vmem:[%s1599_s2 + $0x108] sm:$0xff] }
  0x15   :  { %786 = vmatpush3.msra.mxu1 %v80_v35  ;;  %752 = vmatprep.subr.mxu0 %v63_v36  ;;  %v57_v60 = vld [vmem:[%s1599_s2 + $0x80] sm:$0xff]  ;;  %v33_v63 = vld [vmem:[%s1600_s0 + $0x8] sm:$0xff]  ;;  %v35_v2 = vld [vmem:[%s1600_s0 + $0x18] sm:$0xff] }
  0x16   :  { %787 = vmatprep.subr.mxu1 %v95_v37  ;;  %753 = vmatpush3.msra.mxu0 %v47_v38  ;;  %v89_v61 = vld [vmem:[%s1599_s2 + $0x180] sm:$0xff]  ;;  %v136_v3 = vld [vmem:[%s1599_s2 + $0x2f8] sm:$0xff]  ;;  %v34_v5 = vld [vmem:[%s1600_s0 + $0x10] sm:$0xff] }
  0x17   :  { %788 = vmatpush3.msra.mxu1 %v79_v39  ;;  %754 = vmatprep.subr.mxu0 %v62_v40  ;;  %v41_v62 = vld [vmem:[%s1599_s2] sm:$0xff]  ;;  %v168_v4 = vld [vmem:[%s1599_s2 + $0x3f8] sm:$0xff]  ;;  %v135_v8 = vld [vmem:[%s1599_s2 + $0x2f0] sm:$0xff] }
  0x18   :  { %789 = vmatprep.subr.mxu1 %v94_v41  ;;  %755 = vmatpush3.msra.mxu0 %v46_v42  ;;  %v73_v0 = vld [vmem:[%s1599_s2 + $0x100] sm:$0xff]  ;;  %v120_v6 = vld [vmem:[%s1599_s2 + $0x278] sm:$0xff]  ;;  %v167_v9 = vld [vmem:[%s1599_s2 + $0x3f0] sm:$0xff] }
  0x19   :  { %790 = vmatpush3.msra.mxu1 %v78_v43  ;;  %756 = vmatprep.subr.mxu0 %v61_v44  ;;  %v32_v1 = vld [vmem:[%s1600_s0] sm:$0xff]  ;;  %v152_v7 = vld [vmem:[%s1599_s2 + $0x378] sm:$0xff]  ;;  %v119_v10 = vld [vmem:[%s1599_s2 + $0x270] sm:$0xff] }
  0x1a   :  { %791 = vmatprep.subr.mxu1 %v93_v45  ;;  %757 = vmatpush3.msra.mxu0 %v45_v46  ;;  %v151_v11 = vld [vmem:[%s1599_s2 + $0x370] sm:$0xff]  ;;  %v134_v12 = vld [vmem:[%s1599_s2 + $0x2e8] sm:$0xff]  ;;  %v133_v16 = vld [vmem:[%s1599_s2 + $0x2e0] sm:$0xff] }
  0x1b   :  { %792 = vmatpush3.msra.mxu1 %v77_v47  ;;  %758 = vmatprep.subr.mxu0 %v60_v48  ;;  %v166_v13 = vld [vmem:[%s1599_s2 + $0x3e8] sm:$0xff]  ;;  %v165_v17 = vld [vmem:[%s1599_s2 + $0x3e0] sm:$0xff]  ;;  %v132_v20 = vld [vmem:[%s1599_s2 + $0x2d8] sm:$0xff] }
  0x1c   :  { %793 = vmatprep.subr.mxu1 %v92_v49  ;;  %759 = vmatpush3.msra.mxu0 %v44_v50  ;;  %v118_v14 = vld [vmem:[%s1599_s2 + $0x268] sm:$0xff]  ;;  %v117_v18 = vld [vmem:[%s1599_s2 + $0x260] sm:$0xff]  ;;  %v164_v21 = vld [vmem:[%s1599_s2 + $0x3d8] sm:$0xff] }
  0x1d   :  { %794 = vmatpush3.msra.mxu1 %v76_v51  ;;  %760 = vmatprep.subr.mxu0 %v59_v52  ;;  %v150_v15 = vld [vmem:[%s1599_s2 + $0x368] sm:$0xff]  ;;  %v149_v19 = vld [vmem:[%s1599_s2 + $0x360] sm:$0xff]  ;;  %v116_v22 = vld [vmem:[%s1599_s2 + $0x258] sm:$0xff] }
  0x1e   :  { %795 = vmatprep.subr.mxu1 %v91_v53  ;;  %761 = vmatpush3.msra.mxu0 %v43_v54  ;;  %v148_v23 = vld [vmem:[%s1599_s2 + $0x358] sm:$0xff]  ;;  %v131_v24 = vld [vmem:[%s1599_s2 + $0x2d0] sm:$0xff]  ;;  %v130_v28 = vld [vmem:[%s1599_s2 + $0x2c8] sm:$0xff] }
  0x1f   :  { %796 = vmatpush3.msra.mxu1 %v75_v55  ;;  %762 = vmatprep.subr.mxu0 %v58_v56  ;;  %v163_v25 = vld [vmem:[%s1599_s2 + $0x3d0] sm:$0xff]  ;;  %v162_v29 = vld [vmem:[%s1599_s2 + $0x3c8] sm:$0xff]  ;;  %v129_v32 = vld [vmem:[%s1599_s2 + $0x2c0] sm:$0xff] }
  0x20   :  { %797 = vmatprep.subr.mxu1 %v90_v57  ;;  %763 = vmatpush3.msra.mxu0 %v42_v58  ;;  %v115_v26 = vld [vmem:[%s1599_s2 + $0x250] sm:$0xff]  ;;  %v114_v30 = vld [vmem:[%s1599_s2 + $0x248] sm:$0xff]  ;;  %v161_v33 = vld [vmem:[%s1599_s2 + $0x3c0] sm:$0xff] }
  0x21   :  { %798 = vmatpush3.msra.mxu1 %v74_v59  ;;  %764 = vmatprep.subr.mxu0 %v57_v60  ;;  %v147_v27 = vld [vmem:[%s1599_s2 + $0x350] sm:$0xff]  ;;  %v146_v31 = vld [vmem:[%s1599_s2 + $0x348] sm:$0xff]  ;;  %v113_v34 = vld [vmem:[%s1599_s2 + $0x240] sm:$0xff] }
  0x22   :  { %799 = vmatprep.subr.mxu1 %v89_v61  ;;  %765 = vmatpush3.msra.mxu0 %v41_v62  ;;  %v145_v35 = vld [vmem:[%s1599_s2 + $0x340] sm:$0xff]  ;;  %v128_v36 = vld [vmem:[%s1599_s2 + $0x2b8] sm:$0xff]  ;;  %v127_v40 = vld [vmem:[%s1599_s2 + $0x2b0] sm:$0xff] }
  0x23   :  { %240 = vmatprep.mubr.f32.mxu0 %v33_v63  ;;  %800 = vmatpush3.msra.mxu1 %v73_v0  ;;  %v160_v37 = vld [vmem:[%s1599_s2 + $0x3b8] sm:$0xff]  ;;  %v159_v41 = vld [vmem:[%s1599_s2 + $0x3b0] sm:$0xff]  ;;  %v126_v44 = vld [vmem:[%s1599_s2 + $0x2a8] sm:$0xff] }
  0x24   :  { %241 = vmatmul.mubr.f32.vlgmr.msra.gmra.mxu0 %v32_v1  ;;  %310 = vmatprep.mubr.f32.mxu1 %v35_v2  ;;  %v112_v38 = vld [vmem:[%s1599_s2 + $0x238] sm:$0xff]  ;;  %v111_v42 = vld [vmem:[%s1599_s2 + $0x230] sm:$0xff]  ;;  %v158_v45 = vld [vmem:[%s1599_s2 + $0x3a8] sm:$0xff] }
  0x25   :  { %804 = vmatprep.subr.mxu0 %v136_v3  ;;  %839 = vmatprep.subr.mxu1 %v168_v4  ;;  %v144_v39 = vld [vmem:[%s1599_s2 + $0x338] sm:$0xff]  ;;  %v143_v43 = vld [vmem:[%s1599_s2 + $0x330] sm:$0xff]  ;;  %v110_v46 = vld [vmem:[%s1599_s2 + $0x228] sm:$0xff] }
  0x26   :  { %311 = vmatmul.mubr.f32.vlgmr.msra.gmra.mxu1 %v34_v5  ;;  %805 = vmatpush3.msra.mxu0 %v120_v6  ;;  %v142_v47 = vld [vmem:[%s1599_s2 + $0x328] sm:$0xff]  ;;  %v125_v48 = vld [vmem:[%s1599_s2 + $0x2a0] sm:$0xff]  ;;  %v124_v52 = vld [vmem:[%s1599_s2 + $0x298] sm:$0xff] }
  0x27   :  { %840 = vmatpush3.msra.mxu1 %v152_v7  ;;  %806 = vmatprep.subr.mxu0 %v135_v8  ;;  %v157_v49 = vld [vmem:[%s1599_s2 + $0x3a0] sm:$0xff]  ;;  %v156_v53 = vld [vmem:[%s1599_s2 + $0x398] sm:$0xff]  ;;  %v123_v56 = vld [vmem:[%s1599_s2 + $0x290] sm:$0xff]  ;;  %v987_v8 = vmov 0.0  }
  0x28   :  { %841 = vmatprep.subr.mxu1 %v167_v9  ;;  %807 = vmatpush3.msra.mxu0 %v119_v10  ;;  %v109_v50 = vld [vmem:[%s1599_s2 + $0x220] sm:$0xff]  ;;  %v108_v54 = vld [vmem:[%s1599_s2 + $0x218] sm:$0xff]  ;;  %v155_v57 = vld [vmem:[%s1599_s2 + $0x390] sm:$0xff] }
  0x29   :  { %842 = vmatpush3.msra.mxu1 %v151_v11  ;;  %808 = vmatprep.subr.mxu0 %v134_v12  ;;  %v141_v51 = vld [vmem:[%s1599_s2 + $0x320] sm:$0xff]  ;;  %v140_v55 = vld [vmem:[%s1599_s2 + $0x318] sm:$0xff]  ;;  %v107_v58 = vld [vmem:[%s1599_s2 + $0x210] sm:$0xff] }
  0x2a   :  { %843 = vmatprep.subr.mxu1 %v166_v13  ;;  %809 = vmatpush3.msra.mxu0 %v118_v14  ;;  %v139_v59 = vld [vmem:[%s1599_s2 + $0x310] sm:$0xff]  ;;  %v122_v60 = vld [vmem:[%s1599_s2 + $0x288] sm:$0xff]  ;;  %v121_v0 = vld [vmem:[%s1599_s2 + $0x280] sm:$0xff] }
  0x2b   :  { %844 = vmatpush3.msra.mxu1 %v150_v15  ;;  %810 = vmatprep.subr.mxu0 %v133_v16  ;;  %v154_v61 = vld [vmem:[%s1599_s2 + $0x388] sm:$0xff]  ;;  %v153_v1 = vld [vmem:[%s1599_s2 + $0x380] sm:$0xff]  ;;  %v39_v5 = vld [vmem:[%s1600_s0 + $0x38] sm:$0xff] }
  0x2c   :  { %845 = vmatprep.subr.mxu1 %v165_v17  ;;  %811 = vmatpush3.msra.mxu0 %v117_v18  ;;  %v106_v62 = vld [vmem:[%s1599_s2 + $0x208] sm:$0xff]  ;;  %v105_v2 = vld [vmem:[%s1599_s2 + $0x200] sm:$0xff]  ;;  %v38_v7 = vld [vmem:[%s1600_s0 + $0x30] sm:$0xff] }
  0x2d   :  { %846 = vmatpush3.msra.mxu1 %v149_v19  ;;  %812 = vmatprep.subr.mxu0 %v132_v20  ;;  %v138_v63 = vld [vmem:[%s1599_s2 + $0x308] sm:$0xff]  ;;  %v137_v4 = vld [vmem:[%s1599_s2 + $0x300] sm:$0xff]  ;;  %v472_v9 = vld [vmem:[%s1601_s4 + $0x78] sm:$0xff] }
  0x2e   :  { %847 = vmatprep.subr.mxu1 %v164_v21  ;;  %813 = vmatpush3.msra.mxu0 %v116_v22  ;;  %v37_v3 = vld [vmem:[%s1600_s0 + $0x28] sm:$0xff]  ;;  %v36_v6 = vld [vmem:[%s1600_s0 + $0x20] sm:$0xff]  ;;  %v471_v10 = vld [vmem:[%s1601_s4 + $0x70] sm:$0xff] }
  0x2f   :  { %848 = vmatpush3.msra.mxu1 %v148_v23  ;;  %814 = vmatprep.subr.mxu0 %v131_v24  ;;  %v470_v11 = vld [vmem:[%s1601_s4 + $0x68] sm:$0xff]  ;;  %v469_v12 = vld [vmem:[%s1601_s4 + $0x60] sm:$0xff]  ;;  %v468_v13 = vld [vmem:[%s1601_s4 + $0x58] sm:$0xff] }
  0x30   :  { %849 = vmatprep.subr.mxu1 %v163_v25  ;;  %815 = vmatpush3.msra.mxu0 %v115_v26  ;;  %v467_v14 = vld [vmem:[%s1601_s4 + $0x50] sm:$0xff]  ;;  %v466_v15 = vld [vmem:[%s1601_s4 + $0x48] sm:$0xff]  ;;  %v465_v16 = vld [vmem:[%s1601_s4 + $0x40] sm:$0xff] }
  0x31   :  { %850 = vmatpush3.msra.mxu1 %v147_v27  ;;  %816 = vmatprep.subr.mxu0 %v130_v28  ;;  %v464_v17 = vld [vmem:[%s1601_s4 + $0x38] sm:$0xff]  ;;  %v463_v18 = vld [vmem:[%s1601_s4 + $0x30] sm:$0xff]  ;;  %v462_v19 = vld [vmem:[%s1601_s4 + $0x28] sm:$0xff] }
  0x32   :  { %851 = vmatprep.subr.mxu1 %v162_v29  ;;  %817 = vmatpush3.msra.mxu0 %v114_v30  ;;  %v461_v20 = vld [vmem:[%s1601_s4 + $0x20] sm:$0xff]  ;;  %v460_v21 = vld [vmem:[%s1601_s4 + $0x18] sm:$0xff]  ;;  %v459_v22 = vld [vmem:[%s1601_s4 + $0x10] sm:$0xff] }
  0x33   :  { %852 = vmatpush3.msra.mxu1 %v146_v31  ;;  %818 = vmatprep.subr.mxu0 %v129_v32  ;;  %v473_v23 = vld [vmem:[%s1602_s5] sm:$0xf]  ;;  %v458_v24 = vld [vmem:[%s1601_s4 + $0x8] sm:$0xff]  ;;  %v646_v27 = vld [vmem:[%s1604_s7 + $0x78] sm:$0xff] }
  0x34   :  { %853 = vmatprep.subr.mxu1 %v161_v33  ;;  %819 = vmatpush3.msra.mxu0 %v113_v34  ;;  %v40_v25 = vld [vmem:[%s1603_s1] sm:$0xff]  ;;  %v645_v28 = vld [vmem:[%s1604_s7 + $0x70] sm:$0xff]  ;;  %v644_v29 = vld [vmem:[%s1604_s7 + $0x68] sm:$0xff] }
  0x35   :  { %854 = vmatpush3.msra.mxu1 %v145_v35  ;;  %820 = vmatprep.subr.mxu0 %v128_v36  ;;  %v457_v26 = vld [vmem:[%s1601_s4] sm:$0xff]  ;;  %v642_v31 = vld [vmem:[%s1604_s7 + $0x58] sm:$0xff]  ;;  %v641_v32 = vld [vmem:[%s1604_s7 + $0x50] sm:$0xff] }
  0x36   :  { %855 = vmatprep.subr.mxu1 %v160_v37  ;;  %821 = vmatpush3.msra.mxu0 %v112_v38  ;;  %v643_v30 = vld [vmem:[%s1604_s7 + $0x60] sm:$0xff]  ;;  %v640_v33 = vld [vmem:[%s1604_s7 + $0x48] sm:$0xff]  ;;  %v638_v35 = vld [vmem:[%s1604_s7 + $0x38] sm:$0xff] }
  0x37   :  { %856 = vmatpush3.msra.mxu1 %v144_v39  ;;  %822 = vmatprep.subr.mxu0 %v127_v40  ;;  %v639_v34 = vld [vmem:[%s1604_s7 + $0x40] sm:$0xff]  ;;  %v637_v36 = vld [vmem:[%s1604_s7 + $0x30] sm:$0xff]  ;;  %v636_v37 = vld [vmem:[%s1604_s7 + $0x28] sm:$0xff] }
  0x38   :  { %857 = vmatprep.subr.mxu1 %v159_v41  ;;  %823 = vmatpush3.msra.mxu0 %v111_v42  ;;  %v635_v38 = vld [vmem:[%s1604_s7 + $0x20] sm:$0xff] }
  0x39   :  { %858 = vmatpush3.msra.mxu1 %v143_v43  ;;  %824 = vmatprep.subr.mxu0 %v126_v44  ;;  %v729_v43 = vld [vmem:[%s1605_s3] ss:$0 sm:$0xff] }
  0x3a   :  { %859 = vmatprep.subr.mxu1 %v158_v45  ;;  %825 = vmatpush3.msra.mxu0 %v110_v46 }
  0x3b   :  { %860 = vmatpush3.msra.mxu1 %v142_v47  ;;  %826 = vmatprep.subr.mxu0 %v125_v48 }
  0x3c   :  { %861 = vmatprep.subr.mxu1 %v157_v49  ;;  %827 = vmatpush3.msra.mxu0 %v109_v50 }
  0x3d   :  { %862 = vmatpush3.msra.mxu1 %v141_v51  ;;  %828 = vmatprep.subr.mxu0 %v124_v52 }
  0x3e   :  { %863 = vmatprep.subr.mxu1 %v156_v53  ;;  %829 = vmatpush3.msra.mxu0 %v108_v54 }
  0x3f   :  { %864 = vmatpush3.msra.mxu1 %v140_v55  ;;  %830 = vmatprep.subr.mxu0 %v123_v56 }
  0x40   :  { %865 = vmatprep.subr.mxu1 %v155_v57  ;;  %831 = vmatpush3.msra.mxu0 %v107_v58  ;;  %v634_v58 = vld [vmem:[%s1604_s7 + $0x18] sm:$0xff] }
  0x41   :  { %866 = vmatpush3.msra.mxu1 %v139_v59  ;;  %832 = vmatprep.subr.mxu0 %v122_v60  ;;  %v633_v60 = vld [vmem:[%s1604_s7 + $0x10] sm:$0xff] }
  0x42   :  { %867 = vmatprep.subr.mxu1 %v154_v61  ;;  %833 = vmatpush3.msra.mxu0 %v106_v62  ;;  %v632_v61 = vld [vmem:[%s1604_s7 + $0x8] sm:$0xff]  ;;  %v631_v62 = vld [vmem:[%s1604_s7] sm:$0xff] }
  0x43   :  { %868 = vmatpush3.msra.mxu1 %v138_v63  ;;  %834 = vmatprep.subr.mxu0 %v121_v0  ;;  %v732_v0 = vld [vmem:[%s1606_s6] ss:$0 sm:$0xff] }
  0x44   :  { %869 = vmatprep.subr.mxu1 %v153_v1  ;;  %835 = vmatpush3.msra.mxu0 %v105_v2 }
  0x45   :  { %380 = vmatprep.mubr.f32.mxu0 %v37_v3  ;;  %870 = vmatpush3.msra.mxu1 %v137_v4 }
  0x46   :  { %450 = vmatprep.mubr.f32.mxu1 %v39_v5  ;;  %381 = vmatmul.mubr.f32.vlgmr.msra.gmra.mxu0 %v36_v6  ;;  %v733_v5 = vld [vmem:[%s1607_s8] ss:$0 sm:$0xff] }
  0x47   :  { %451 = vmatmul.mubr.f32.vlgmr.msra.gmra.mxu1 %v38_v7  ;;  %915 = vmatprep.subr.mxu1 %v987_v8 }
  0x48   :  { %910 = vmatprep.subr.mxu0 %v987_v8  ;;  %916 = vmatpush3.msra.mxu1 %v472_v9 }
  0x49   :  { %917 = vmatprep.subr.mxu1 %v987_v8  ;;  %911 = vmatpush3.msk.msra.mxu0 %vm478_vm0, %v473_v23 }
  0x4a   :  { %918 = vmatpush3.msra.mxu1 %v471_v10  ;;  %912 = vmatprep.mubr.msk.f32.mxu0 %vm988_vm1, %v987_v8 }
  0x4b   :  { %919 = vmatprep.subr.mxu1 %v987_v8  ;;  %913 = vmatmul.mubr.msk.f32.vlgmr.msra.gmra.mxu0 %vm474_vm2, %v40_v25 }
  0x4c   :  { %920 = vmatpush3.msra.mxu1 %v470_v11  ;;  %947 = vmatprep.mubr.msk.f32.mxu1 %vm988_vm1, %v987_v8 }
  0x4d   :  { %921 = vmatprep.subr.mxu1 %v987_v8  ;;  %950 = vmatprep.subr.mxu0 %v987_v8 }
  0x4e   :  { %922 = vmatpush3.msra.mxu1 %v469_v12  ;;  %982 = vmatprep.mubr.msk.f32.mxu0 %vm988_vm1, %v987_v8 }
  0x4f   :  { %923 = vmatprep.subr.mxu1 %v987_v8  ;;  %951 = vmatpush3.msra.mxu0 %v646_v27 }
  0x50   :  { %924 = vmatpush3.msra.mxu1 %v468_v13  ;;  %952 = vmatprep.subr.mxu0 %v987_v8 }
  0x51   :  { %925 = vmatprep.subr.mxu1 %v987_v8  ;;  %953 = vmatpush3.msra.mxu0 %v645_v28 }
  0x52   :  { %926 = vmatpush3.msra.mxu1 %v467_v14  ;;  %954 = vmatprep.subr.mxu0 %v987_v8 }
  0x53   :  { %927 = vmatprep.subr.mxu1 %v987_v8  ;;  %955 = vmatpush3.msra.mxu0 %v644_v29 }
  0x54   :  { %928 = vmatpush3.msra.mxu1 %v466_v15  ;;  %956 = vmatprep.subr.mxu0 %v987_v8 }
  0x55   :  { %929 = vmatprep.subr.mxu1 %v987_v8  ;;  %957 = vmatpush3.msra.mxu0 %v643_v30 }
  0x56   :  { %930 = vmatpush3.msra.mxu1 %v465_v16  ;;  %958 = vmatprep.subr.mxu0 %v987_v8 }
  0x57   :  { %931 = vmatprep.subr.mxu1 %v987_v8  ;;  %959 = vmatpush3.msra.mxu0 %v642_v31 }
  0x58   :  { %932 = vmatpush3.msra.mxu1 %v464_v17  ;;  %960 = vmatprep.subr.mxu0 %v987_v8 }
  0x59   :  { %933 = vmatprep.subr.mxu1 %v987_v8  ;;  %961 = vmatpush3.msra.mxu0 %v641_v32 }
  0x5a   :  { %934 = vmatpush3.msra.mxu1 %v463_v18  ;;  %962 = vmatprep.subr.mxu0 %v987_v8 }
  0x5b   :  { %935 = vmatprep.subr.mxu1 %v987_v8  ;;  %963 = vmatpush3.msra.mxu0 %v640_v33 }
  0x5c   :  { %936 = vmatpush3.msra.mxu1 %v462_v19  ;;  %964 = vmatprep.subr.mxu0 %v987_v8 }
  0x5d   :  { %937 = vmatprep.subr.mxu1 %v987_v8  ;;  %965 = vmatpush3.msra.mxu0 %v639_v34 }
  0x5e   :  { %938 = vmatpush3.msra.mxu1 %v461_v20  ;;  %966 = vmatprep.subr.mxu0 %v987_v8 }
  0x5f   :  { %939 = vmatprep.subr.mxu1 %v987_v8  ;;  %967 = vmatpush3.msra.mxu0 %v638_v35 }
  0x60   :  { %940 = vmatpush3.msra.mxu1 %v460_v21  ;;  %968 = vmatprep.subr.mxu0 %v987_v8 }
  0x61   :  { %941 = vmatprep.subr.mxu1 %v987_v8  ;;  %969 = vmatpush3.msra.mxu0 %v637_v36 }
  0x62   :  { %942 = vmatpush3.msra.mxu1 %v459_v22  ;;  %970 = vmatprep.subr.mxu0 %v987_v8 }
  0x63   :  { %943 = vmatprep.subr.mxu1 %v987_v8  ;;  %971 = vmatpush3.msra.mxu0 %v636_v37 }
  0x64   :  { %944 = vmatpush3.msra.mxu1 %v458_v24  ;;  %972 = vmatprep.subr.mxu0 %v987_v8 }
  0x65   :  { %945 = vmatprep.subr.mxu1 %v987_v8  ;;  %973 = vmatpush3.msra.mxu0 %v635_v38 }
  0x66   :  { %946 = vmatpush3.msra.mxu1 %v457_v26  ;;  %974 = vmatprep.subr.mxu0 %v987_v8 }
  0x67   :  { %975 = vmatpush3.msra.mxu0 %v634_v58 }
  0x68   :  { %976 = vmatprep.subr.mxu0 %v987_v8 }
  0x69   :  { %977 = vmatpush3.msra.mxu0 %v633_v60 }
  0x6a   :  { %978 = vmatprep.subr.mxu0 %v987_v8 }
  0x6b   :  { %979 = vmatpush3.msra.mxu0 %v632_v61 }
  0x6c   :  { %980 = vmatprep.subr.mxu0 %v987_v8 }
  0x6d   :  { %981 = vmatpush3.msra.mxu0 %v631_v62 }
  0xe4   :  { %v766_v39 = vpop.f32.mrf.mxu0 }
  0xe6   :  { %v801_v40 = vpop.f32.mrf.mxu1  ;;  %v767_v41 = vpop.f32.mrf.mxu0 }
  0xe7   :  { %v768_v42 = vadd.f32 %v767_v41, %v766_v39 }
  0xe8   :  { %v802_v44 = vpop.f32.mrf.mxu1 }
  0xe9   :  { %v243_v45 = vadd.f32 %v768_v42, %v729_v43  ;;  %v803_v46 = vadd.f32 %v802_v44, %v801_v40 }
  0xeb   :  { %v313_v51 = vadd.f32 %v803_v46, %v243_v45 }
 0x106   :  { %v836_v47 = vpop.f32.mrf.mxu0 }
 0x107   :  { %v871_v48 = vpop.f32.mrf.mxu1 }
 0x108   :  { %v837_v49 = vpop.f32.mrf.mxu0 }
 0x109   :  { %v872_v50 = vpop.f32.mrf.mxu1  ;;  %v838_v52 = vadd.f32 %v837_v49, %v836_v47 }
 0x10a   :  { %v873_v54 = vadd.f32 %v872_v50, %v871_v48 }
 0x10b   :  { %v383_v53 = vadd.f32 %v838_v52, %v313_v51  ;;  %v548_v57 = vpop.f32.mrf.mxu0 }
 0x10d   :  { %v453_v55 = vadd.f32 %v873_v54, %v383_v53  ;;  %v914_v59 = vpop.f32.mrf.mxu0 }
 0x10f   :  { %v456_v56 = vmax.f32 %v453_v55, 0.0 }
 0x111   :  { %948 = vmatmul.mubr.f32.vlgmr.msra.gmra.mxu1 %v456_v56 }
 0x1d1   :  { %v618_v63 = vpop.f32.mrf.mxu1 }
 0x1d2   :  { %v619_v1 = vadd.f32 %v618_v63, %v548_v57 }
 0x1d3   :  { %v949_v2 = vpop.f32.mrf.mxu1 }
 0x1d4   :  { %v629_v3 = vadd.f32 %v732_v0, %v619_v1 }
 0x1d6   :  { %v630_v4 = vmax.f32 %v629_v3, 0.0 }
 0x1d8   :  { %983 = vmatmul.mubr.f32.vlgmr.msra.gmra.mxu0 %v630_v4 }
 0x298   :  { %v720_v6 = vpop.f32.mrf.mxu0 }
 0x299   :  { %v721_v7 = vadd.f32 %v733_v5, %v720_v6 }
 0x29a   :  { %v984_v8 = vpop.f32.mrf.mxu0 }
 0x29b   :  { %724 = vst.msk [vmem:[%s1608_s9] sm:$0xff] %vm474_vm2, %v721_v7 }

</bundles_post_ra>
